<compile_context>
chip_gen: v7x
topology: tpu7x:2x2x1
jax: 0.10.0
libtpu: 0.0.40
codegen_flags: <defaults>
</compile_context>

<pallas_src>
import functools
import math

import jax
import jax.numpy as jnp
import numpy as np
from jax.experimental import pallas as pl
from jax.experimental.pallas import tpu as pltpu


# --------------------------- device heuristics ----------------------------- #

def _dequant_compute_dtype():
    """bf16 dequant math on chips with a packed-bf16 VALU (v6e / v7x); f32 else."""
    try:
        kind = jax.devices()[0].device_kind.lower()
    except Exception:
        return jnp.float32
    if ("v6" in kind) or ("v7" in kind) or ("7x" in kind):
        return jnp.bfloat16
    return jnp.float32


# ----------------------- activation fake-quant pre-pass -------------------- #

def _act_fakequant_kernel(x_ref, s_ref, o_ref):
    # Per-token fake-quant (n_bits=8 -> q_max=127, matching the torch default).
    x = x_ref[...].astype(jnp.float32)                       # (tm, tk)
    s = s_ref[...]                                           # (tm, 1) f32
    o_ref[...] = (jnp.clip(jnp.round(x / s), -127.0, 127.0) * s).astype(o_ref.dtype)


def act_fakequant_pallas(x2d, token_scale, bm=None, bk=None):
    """x2d:(M,K) bf16, token_scale:(M,1) f32 -> fake-quantized x (M,K) bf16."""
    m, k = x2d.shape
    tm = bm if bm is not None else _pick_tile(m, 512, 16)
    tk = bk if bk is not None else _pick_tile(k, 1024, 128)
    assert m % tm == 0 and k % tk == 0, (m, k, tm, tk)
    return pl.pallas_call(
        _act_fakequant_kernel,
        out_shape=jax.ShapeDtypeStruct((m, k), jnp.bfloat16),
        grid_spec=pltpu.PrefetchScalarGridSpec(
            num_scalar_prefetch=0,
            grid=(m // tm, k // tk),
            in_specs=[pl.BlockSpec((tm, tk), lambda i, j: (i, j)),
                      pl.BlockSpec((tm, 1), lambda i, j: (i, 0))],
            out_specs=pl.BlockSpec((tm, tk), lambda i, j: (i, j)),
        ),
        compiler_params=pltpu.CompilerParams(
            dimension_semantics=("parallel", "parallel")),
    )(x2d, token_scale)


# ------------------------ dequant + matmul main kernel --------------------- #

def _wa_matmul_kernel(xq_ref, wq_ref, ws_ref, wzs_ref, b_ref, o_ref, acc_ref,
                      *, compute_dtype):
    k_idx = pl.program_id(2)

    @pl.when(k_idx == 0)
    def _init():
        acc_ref[...] = jnp.zeros_like(acc_ref)

    tk, tn = wq_ref.shape                      # static block shape
    gpb = ws_ref.shape[0]                      # weight groups in this K-tile
    gsz = tk // gpb                            # group size along K

    # Group-wise dequant with pre-folded zero point: w = q * s - (z * s).
    # int8 -> f32 -> compute dtype (chained convert keeps lowering simple);
    # the big (gpb, gsz, tn) mul/sub runs in bf16 on v6e/v7x, f32 on v5e.
    q = wq_ref[...].astype(jnp.float32).astype(compute_dtype)
    s = ws_ref[...].astype(compute_dtype)[:, None, :]        # (gpb, 1, tn)
    zs = wzs_ref[...].astype(compute_dtype)[:, None, :]      # (gpb, 1, tn)
    w = (q.reshape(gpb, gsz, tn) * s - zs).reshape(tk, tn).astype(jnp.bfloat16)

    # MXU: bf16 x bf16 -> f32 accumulation. x_q was fake-quantized by the
    # pre-pass, so there is NO per-N-tile activation work here anymore.
    acc_ref[...] += jnp.dot(xq_ref[...], w, preferred_element_type=jnp.float32)

    @pl.when(k_idx == pl.num_programs(2) - 1)
    def _finalize():
        o_ref[...] = (acc_ref[...] + b_ref[...]).astype(o_ref.dtype)


# --------------------------- tiling heuristics ------------------------------ #

def _pick_tile(dim, cap, mult):
    """Largest multiple of `mult` dividing `dim`, <= min(dim, cap); else full."""
    cap = min(dim, cap)
    t = (cap // mult) * mult
    while t >= mult:
        if dim % t == 0:
            return t
        t -= mult
    return dim


def _pick_tk(k, group, cap=1024):
    """K-tile: multiple of lcm(8*group, 128) so the (groups_per_tile, tn)
    metadata blocks stay sublane aligned and the x blocks stay lane aligned.
    Capped (default 1024) so per-step VMEM fits v7x; falls back to a full-K
    strip only when nothing smaller divides K."""
    cap = max(min(k, cap), group)
    step = 8 * group
    if step % 128 != 0:
        step = step * 128 // math.gcd(step, 128)
    t = (cap // step) * step
    while t >= step:
        if k % t == 0:
            return t
        t -= step
    return k            # last resort: full-K strip (gpb == n_groups, still legal)


# ------------------------------ pallas_call -------------------------------- #

def wa_matmul_pallas(xq, wq_t, ws_t, wzs_t, bias_row, *, compute_dtype,
                     tn_cap=256, bm=None, bn=None, bk=None):
    """xq:(M,K) bf16 fake-quantized activations, wq_t:(K,N) int8/bf16 quant
    levels, ws_t:(G,N) f32 group scale, wzs_t:(G,N) f32 pre-folded zero*scale,
    bias_row:(1,N) f32  ->  (M,N) bf16."""
    m, k = xq.shape
    n = wq_t.shape[1]
    n_groups = ws_t.shape[0]
    group = k // n_groups

    tm = bm if bm is not None else _pick_tile(m, 512, 16)
    tn = bn if bn is not None else _pick_tile(n, tn_cap, 128)
    tk = bk if bk is not None else _pick_tk(k, group, 1024)

    # v7x shards the parallel grid axes over 2 TensorCores; for decode-like
    # shapes make sure the parallel iteration space has at least 2 steps.
    if bn is None and (m // tm) == 1 and (n // tn) == 1 and tn % 256 == 0:
        tn //= 2

    assert m % tm == 0 and n % tn == 0 and k % tk == 0, (m, n, k, tm, tn, tk)
    assert tk % group == 0, (tk, group)
    gpb = tk // group
    # Keep the (gpb, tn) metadata blocks sublane-aligned (f32 tile is (8, 128)).
    assert gpb % 8 == 0 or gpb == n_groups, (gpb, n_groups)

    grid = (m // tm, n // tn, k // tk)
    kernel = functools.partial(_wa_matmul_kernel, compute_dtype=compute_dtype)
    return pl.pallas_call(
        kernel,
        out_shape=jax.ShapeDtypeStruct((m, n), jnp.bfloat16),
        grid_spec=pltpu.PrefetchScalarGridSpec(
            num_scalar_prefetch=0,
            grid=grid,
            in_specs=[
                pl.BlockSpec((tm, tk), lambda i, j, kk: (i, kk)),    # x_q (bf16)
                pl.BlockSpec((tk, tn), lambda i, j, kk: (kk, j)),    # q levels
                pl.BlockSpec((gpb, tn), lambda i, j, kk: (kk, j)),   # group scale
                pl.BlockSpec((gpb, tn), lambda i, j, kk: (kk, j)),   # group zero*scale
                pl.BlockSpec((1, tn), lambda i, j, kk: (0, j)),      # bias row
            ],
            out_specs=pl.BlockSpec((tm, tn), lambda i, j, kk: (i, j)),
            scratch_shapes=[pltpu.VMEM((tm, tn), jnp.float32)],
        ),
        compiler_params=pltpu.CompilerParams(
            dimension_semantics=("parallel", "parallel", "arbitrary")),
    )(xq, wq_t, ws_t, wzs_t, bias_row)


# ------------------------------- module port ------------------------------- #

class WALinearPallas:
    """JAX/Pallas port of kv_quant ... qlinear.hqwa.WALinear (forward only)."""

    def __init__(self, in_features, out_features, bias, w_bit, a_bit,
                 weight_group, max_length, key, tile_mnk=(None, None, None)):
        self.in_features = in_features
        self.out_features = out_features
        self.w_bit = w_bit
        self.a_bit = a_bit
        self.weight_group = weight_group if weight_group != -1 else in_features
        assert in_features % self.weight_group == 0
        self.max_length = max_length
        self.length = 0
        self.tile_mnk = tile_mnk

        n_groups = in_features // self.weight_group
        q_levels = 2 ** w_bit
        k0, k1, k2, k3, k4 = jax.random.split(key, 5)

        # Deterministic synthetic "checkpoint": unpacked integer weight levels
        # (stands in for deq_{w_bit}bit_tensor(qweight)), group scales/zeros,
        # per-token activation scales and bias -- dtypes match the torch buffers.
        self.q_weight = jax.random.randint(
            k0, (out_features, in_features), 0, q_levels, dtype=jnp.int32)
        self.weight_scale = jax.random.uniform(
            k1, (out_features, n_groups), minval=0.005, maxval=0.03
        ).astype(jnp.float16)
        self.weight_zero = jax.random.randint(
            k2, (out_features, n_groups), 0, q_levels, dtype=jnp.int8)
        self.act_scale = jax.random.uniform(
            k3, (1, max_length, 1), minval=0.01, maxval=0.08
        ).astype(jnp.float16)
        if bias:
            self.bias = (0.1 * jax.random.normal(
                k4, (out_features,))).astype(jnp.float16)
        else:
            self.bias = None

        # ---- cached static preprocessing (weights are frozen; done ONCE) ----
        # Quant levels kept narrow (int8 when they fit) and pre-transposed to
        # (K, N) so the kernel streams 1 byte/weight with no in-kernel transpose.
        lvl_dtype = jnp.int8 if q_levels <= 128 else jnp.bfloat16
        self._wq_t = self.q_weight.T.astype(lvl_dtype)                # (K, N)
        ws32 = self.weight_scale.astype(jnp.float32)                  # (N, G)
        wz32 = self.weight_zero.astype(jnp.float32)                   # (N, G)
        self._ws_t = ws32.T                                           # (G, N) f32
        self._wzs_t = (wz32 * ws32).T                                 # (G, N) f32, pre-folded zero
        if self.bias is not None:
            self._bias_row = self.bias.astype(jnp.float32).reshape(1, -1)
        else:
            self._bias_row = jnp.zeros((1, out_features), jnp.float32)

        # Generation-dependent compute dtype / N-tile cap.
        self._cdt = _dequant_compute_dtype()
        self._tn_cap = 512 if self._cdt == jnp.bfloat16 else 256

    def __call__(self, x):
        flag_0 = flag_1 = False
        if x.ndim == 2:
            if x.shape[0] == 1:
                flag_0 = True
                x = x[None]
            elif x.shape[1] == 1:
                flag_1 = True
                x = x[:, None]
        B, T, K = x.shape
        assert K == self.in_features

        # act_scale slicing / length bookkeeping (matches gemm_forward_cuda).
        # TODO(synk): self.length is Python-side mutable state like the torch
        #             module; it is not jit/scan friendly.
        if T == 1:
            assert self.length + 1 <= self.max_length, "decode past max_length"
            act_scale_t = self.act_scale[:, self.length:self.length + 1, :]
            self.length += 1
        else:
            assert T <= self.max_length, "sequence longer than max_length"
            act_scale_t = self.act_scale[:, :T, :]
            self.length = T

        # ---- per-call glue: only x-dependent work (weights are pre-cached) ----
        x2d = x.astype(jnp.bfloat16).reshape(B * T, K)
        scales = jnp.broadcast_to(
            act_scale_t.astype(jnp.float32), (B, T, 1)).reshape(B * T, 1)

        # 1) fake-quantize the activations once (elementwise Pallas pre-pass).
        xq = act_fakequant_pallas(x2d, scales)

        # 2) dequant-weights + matmul + bias.
        bm, bn, bk = self.tile_mnk
        out = wa_matmul_pallas(xq, self._wq_t, self._ws_t, self._wzs_t,
                               self._bias_row, compute_dtype=self._cdt,
                               tn_cap=self._tn_cap, bm=bm, bn=bn, bk=bk)
        out = out.astype(jnp.float16).reshape(B, T, self.out_features)

        if flag_0:
            out = out[0]
        if flag_1:
            out = out[:, 0]
        return out


# ------------------------------- reference --------------------------------- #

def _reference_forward(mod, x):
    """Pure-jnp reference (f32 matmul) with the same math, for a sanity check.
    Valid for the first (prefill) call only, like the torch act_scale[:, :T]."""
    B, T, K = x.shape
    s = jnp.broadcast_to(
        mod.act_scale[:, :T, :].astype(jnp.float32), (B, T, 1))
    # bf16 activation ingest matches the kernel path.
    # TODO(synk): original torch quantizes straight from the fp16 activations.
    xf = x.astype(jnp.bfloat16).astype(jnp.float32)
    x_q = jnp.clip(jnp.round(xf / s), -127.0, 127.0) * s
    g = mod.weight_group
    w = ((mod.q_weight.astype(jnp.float32)
          - jnp.repeat(mod.weight_zero.astype(jnp.float32), g, axis=1))
         * jnp.repeat(mod.weight_scale.astype(jnp.float32), g, axis=1))
    out = jnp.einsum('btk,nk->btn', x_q, w, preferred_element_type=jnp.float32)
    if mod.bias is not None:
        out = out + mod.bias.astype(jnp.float32)
    return out.astype(jnp.float16)


if __name__ == "__main__":
    key = jax.random.PRNGKey(0)
    k_param, k_x = jax.random.split(key)

    in_features, out_features = 256, 256
    B, T = 2, 16
    # Small explicit tiles so the demo exercises a real 2x2x2 grid
    # (M=32/tm=16, N=256/tn=128, K=256/tk=128, 8 weight groups per K-tile).
    mod = WALinearPallas(in_features, out_features, bias=True,
                         w_bit=4, a_bit=8, weight_group=16,
                         max_length=64, key=k_param,
                         tile_mnk=(16, 128, 128))

    x = jax.random.normal(k_x, (B, T, in_features)).astype(jnp.float16)

    out = jax.block_until_ready(mod(x))
    ref = jax.block_until_ready(_reference_forward(mod, x))

    assert out.shape == (B, T, out_features) and out.dtype == jnp.float16
    np.testing.assert_allclose(np.asarray(out, np.float32),
                               np.asarray(ref, np.float32),
                               rtol=2e-2, atol=6e-2)
    print("KERNEL_OK")
</pallas_src>

<mosaic_0001>
module attributes {stable_mosaic.version = 11 : i64} {
  func.func @_act_fakequant_kernel(%arg0: i32, %arg1: i32, %arg2: memref<32x256xbf16, #tpu.memory_space<vmem>>, %arg3: memref<32x1xf32, #tpu.memory_space<vmem>>, %arg4: memref<32x256xbf16, #tpu.memory_space<vmem>>) attributes {dimension_semantics = [#tpu.dimension_semantics<parallel>, #tpu.dimension_semantics<parallel>], iteration_bounds = array<i64: 1, 1>, scalar_prefetch = 0 : i64, scratch_operands = 0 : i64, tpu.core_type = #tpu.core_type<tc>, window_params = [{transform_indices = @transform_0, window_bounds = array<i64: 32, 256>}, {transform_indices = @transform_1, window_bounds = array<i64: 32, 1>}, {transform_indices = @transform_2, window_bounds = array<i64: 32, 256>}]} {
    %c0 = arith.constant 0 : index
    %c0_0 = arith.constant 0 : index
    %0 = vector.load %arg2[%c0, %c0_0] : memref<32x256xbf16, #tpu.memory_space<vmem>>, vector<32x256xbf16>
    %1 = arith.extf %0 : vector<32x256xbf16> to vector<32x256xf32>
    %c0_1 = arith.constant 0 : index
    %c0_2 = arith.constant 0 : index
    %2 = vector.load %arg3[%c0_1, %c0_2] : memref<32x1xf32, #tpu.memory_space<vmem>>, vector<32x1xf32>
    %3 = vector.broadcast %2 : vector<32x1xf32> to vector<32x256xf32>
    %4 = arith.divf %1, %3 : vector<32x256xf32>
    %5 = math.roundeven %4 : vector<32x256xf32>
    %cst = arith.constant -1.270000e+02 : f32
    %cst_3 = arith.constant 1.270000e+02 : f32
    %6 = vector.broadcast %cst : f32 to vector<32x256xf32>
    %7 = arith.maximumf %6, %5 : vector<32x256xf32>
    %8 = vector.broadcast %cst_3 : f32 to vector<32x256xf32>
    %9 = arith.minimumf %8, %7 : vector<32x256xf32>
    %10 = vector.broadcast %2 : vector<32x1xf32> to vector<32x256xf32>
    %11 = arith.mulf %9, %10 : vector<32x256xf32>
    %12 = arith.truncf %11 : vector<32x256xf32> to vector<32x256xbf16>
    %c0_4 = arith.constant 0 : index
    %c0_5 = arith.constant 0 : index
    %13 = vector.load %arg4[%c0_4, %c0_5] : memref<32x256xbf16, #tpu.memory_space<vmem>>, vector<32x256xbf16>
    tpu.vector_store %arg4[%c0_4, %c0_5], %12 {strides = array<i32>} : memref<32x256xbf16, #tpu.memory_space<vmem>>, vector<32x256xbf16>,
    return
  }
  func.func @transform_0(%arg0: i32, %arg1: i32) -> (i32, i32) {
    %c0_i32 = arith.constant 0 : i32
    return %arg0, %arg1 : i32, i32
  }
  func.func @transform_1(%arg0: i32, %arg1: i32) -> (i32, i32) {
    %c0_i32 = arith.constant 0 : i32
    %c0_i32_0 = arith.constant 0 : i32
    return %arg0, %c0_i32 : i32, i32
  }
  func.func @transform_2(%arg0: i32, %arg1: i32) -> (i32, i32) {
    %c0_i32 = arith.constant 0 : i32
    return %arg0, %arg1 : i32, i32
  }
}

</mosaic_0001>

<bundles_post_ra>
// kernel: tpu_custom_call.1
= control target key start
LH: loop header
LB: loop body
LE: loop exit
PB: predicated region body
PF: predicated region fallthrough
CT: control target
= control target key end

     0   :  { %v198_v2 = vmov 0   ;;  %s253_s0 = inlined_call_operand.vmem [shape: bf16[32,256], index: 0, kind: input, shape index: {}]   ;;  %s254_s1 = inlined_call_operand.vmem [shape: f32[32,1], index: 1, kind: input, shape index: {}]   ;;  %s255_s2 = inlined_call_operand.hbm [shape: bf16[32,256], index: 2, kind: output, shape index: {}]  }
   0x1   :  { %v26_v0 = vld [vmem:[%s254_s1 + $0x10] sm:$0xff]  ;;  %v24_v1 = vld [vmem:[%s254_s1] sm:$0xff]  ;;  %165 = vset.pattern.permute.xlu1 %v198_v2  ;;  %164 = vset.pattern.permute.xlu0 %v198_v2 }
   0x2   :  { %7 = vsyncpa [#allocation3], 0  ;;  %40 = vperm.xlu1 %165, %v26_v0   ;;  %30 = vperm.xlu0 %164, %v24_v1   ;;  %v27_v3 = vld [vmem:[%s254_s1 + $0x18] sm:$0xff]  ;;  %v25_v4 = vld [vmem:[%s254_s1 + $0x8] sm:$0xff] }
   0x3   :  { %v14_v9 = vld [vmem:[%s253_s0 + $0x10] sm:$0xff]  ;;  %v12_v10 = vld [vmem:[%s253_s0] sm:$0xff]  ;;  %v15_v15 = vld [vmem:[%s253_s0 + $0x18] sm:$0xff] }
   0x4   :  { %v20_v11 = vunpack.c.l.bf16 %v14_v9  ;;  %v21_v12 = vunpack.c.h.bf16 %v14_v9  ;;  %v16_v13 = vunpack.c.l.bf16 %v12_v10  ;;  %v17_v14 = vunpack.c.h.bf16 %v12_v10  ;;  %v13_v16 = vld [vmem:[%s253_s0 + $0x8] sm:$0xff]  ;;  %s199_s0 = smov [#allocation2]  }
   0x5   :  { %v22_v21 = vunpack.c.l.bf16 %v15_v15  ;;  %v23_v22 = vunpack.c.h.bf16 %v15_v15  ;;  %v18_v25 = vunpack.c.l.bf16 %v13_v16  ;;  %v19_v26 = vunpack.c.h.bf16 %v13_v16  ;;  %s125_s24 = sshll.u32 %s199_s0, 4  ;;  %s126_s24 = int_to_ptr.vmem [resolvable:$true] %s125_s24 }
   0x6   :  { %45 = vperm.xlu1 %165, %v27_v3   ;;  %35 = vperm.xlu0 %164, %v25_v4   ;;  %s174_s25 = scalar_lea.vmem %s126_s24, 512  ;;  %p179_p1 = scmp.lt.s32.totalorder %s126_s24, %s126_s24 }
   0x7   :  { %p175_p0 = scmp.ne.s32.totalorder %s126_s24, %s174_s25  ;;  %p180_p2 = scmp.lt.s32.totalorder %s174_s25, %s174_s25 }
   0x9   :  { %p181_p3 = por %p180_p2, %p179_p1 }
   0xb   :  { %p182_p4 = pnand %p181_p3, %p175_p0 }
  0x81   :  { %v41_v5 = vpop.permute.xlu1 %40  ;;  %v31_v6 = vpop.permute.xlu0 %30 }
  0x82   :  { %166 = vrcp.f32 %v41_v5 }
  0x83   :  { %168 = vrcp.f32 %v31_v6 }
  0x85   :  { %v46_v7 = vpop.permute.xlu1 %45  ;;  %v36_v8 = vpop.permute.xlu0 %35 }
  0x86   :  { %170 = vrcp.f32 %v46_v7 }
  0x87   :  { %172 = vrcp.f32 %v36_v8 }
  0x8c   :  { %v167_v17 = vpop.eup %166 }
  0x8d   :  { %v169_v18 = vpop.eup %168  ;;  %v55_v19 = vmul.f32 %v167_v17, %v20_v11  ;;  %v56_v20 = vmul.f32 %v167_v17, %v21_v12 }
  0x8e   :  { %v49_v23 = vmul.f32 %v169_v18, %v16_v13  ;;  %v50_v24 = vmul.f32 %v169_v18, %v17_v14 }
  0x8f   :  { %v156_v27 = vround.rtne.f32 %v55_v19  ;;  %v157_v28 = vround.rtne.f32 %v56_v20 }
  0x90   :  { %v171_v29 = vpop.eup %170  ;;  %v152_v30 = vround.rtne.f32 %v49_v23  ;;  %v153_v31 = vround.rtne.f32 %v50_v24 }
  0x91   :  { %v173_v32 = vpop.eup %172  ;;  %v140_v33 = vclamps-f32 %v156_v27, 127.0  ;;  %v141_v34 = vclamps-f32 %v157_v28, 127.0  ;;  %v58_v35 = vmul.f32 %v171_v29, %v22_v21  ;;  %v59_v36 = vmul.f32 %v171_v29, %v23_v22 }
  0x92   :  { %v136_v37 = vclamps-f32 %v152_v30, 127.0  ;;  %v137_v38 = vclamps-f32 %v153_v31, 127.0  ;;  %v52_v39 = vmul.f32 %v173_v32, %v18_v25  ;;  %v53_v40 = vmul.f32 %v173_v32, %v19_v26 }
  0x93   :  { %v88_v41 = vmul.f32 %v140_v33, %v41_v5  ;;  %v89_v42 = vmul.f32 %v141_v34, %v41_v5  ;;  %v158_v43 = vround.rtne.f32 %v58_v35  ;;  %v159_v44 = vround.rtne.f32 %v59_v36 }
  0x94   :  { %v84_v45 = vmul.f32 %v136_v37, %v31_v6  ;;  %v85_v46 = vmul.f32 %v137_v38, %v31_v6  ;;  %v154_v47 = vround.rtne.f32 %v52_v39  ;;  %v155_v48 = vround.rtne.f32 %v53_v40 }
  0x95   :  { %v150_v49 = vpack.c.bf16 %v89_v42, %v88_v41  ;;  %v142_v50 = vclamps-f32 %v158_v43, 127.0  ;;  %v143_v51 = vclamps-f32 %v159_v44, 127.0 }
  0x96   :  { %v148_v52 = vpack.c.bf16 %v85_v46, %v84_v45  ;;  %v138_v53 = vclamps-f32 %v154_v47, 127.0  ;;  %v139_v54 = vclamps-f32 %v155_v48, 127.0 }
  0x97   :  { %118 = vst [vmem:[#allocation2 + $0x10] sm:$0xff] %v150_v49  ;;  %v90_v55 = vmul.f32 %v142_v50, %v46_v7  ;;  %v91_v56 = vmul.f32 %v143_v51, %v46_v7 }
  0x98   :  { %116 = vst [vmem:[#allocation2] sm:$0xff] %v148_v52  ;;  %v86_v57 = vmul.f32 %v138_v53, %v36_v8  ;;  %v87_v58 = vmul.f32 %v139_v54, %v36_v8 }
  0x99   :  { %v151_v59 = vpack.c.bf16 %v91_v56, %v90_v55 }
  0x9a   :  { %v149_v60 = vpack.c.bf16 %v87_v58, %v86_v57 }
  0x9b   :  { %119 = vst [vmem:[#allocation2 + $0x18] sm:$0xff] %v151_v59 }
  0x9c   :  { %117 = vst [vmem:[#allocation2 + $0x8] sm:$0xff] %v149_v60 }
  0x9d   :  { %185 = shalt.err (!%p182_p4)
}
  0x9e   :  { %s186_s28 = scalar_lea.hbm %s255_s2, 512 }
  0x9f   :  { %p187_p5 = scmp.ne.s32.totalorder %s255_s2, %s186_s28  ;;  %p190_p6 = scmp.lt.u32.totalorder %s186_s28, %s255_s2 }
  0xa1   :  { %p192_p7 = pnand %p190_p6, %p187_p5 }
  0xa3   :  { %195 = shalt.err (!%p192_p7)
}
  0xa4   :  { %s200_s5 = smov 128   ;;  %s201_s6 = smov 8  }
  0xa5   :  { %131 = dma.vmem_to_hbm [thread:$0]  %s126_s24, 512, %s255_s2, [#allocation3], %s200_s5, %s200_s5, %s201_s6  }
  0xa6   :  { %196 = dma.done.wait [#allocation3], 512  }
  0xa7   :  { %197 = vsyncadd [#allocation3], 4294966784 }
  0xa8   :  { %135 = vsyncpa [#allocation3], 1 }

</bundles_post_ra>
